<compile_context>
chip_gen: v7x
topology: tpu7x:2x2x1
jax: 0.10.0
libtpu: 0.0.40
codegen_flags: <defaults>
</compile_context>

<pallas_src>
import functools
import math

import jax
import jax.numpy as jnp
from jax.experimental import pallas as pl
from jax.experimental.pallas import tpu as pltpu

_LANE = 128


def _round_up(x, m):
    return (x + m - 1) // m * m


def _cdiv(a, b):
    return (a + b - 1) // b


def _sublane(dtype):
    # f32 -> 8, bf16 -> 16, int8/fp8 -> 32
    return max(8, 32 // jnp.dtype(dtype).itemsize)


def _vmem_capacity_bytes():
    """Physical per-TensorCore VMEM (64 MiB on v7x, 128 MiB on v5e/v6e)."""
    try:
        cap = int(pltpu.get_tpu_info().vmem_capacity_bytes)
        if cap > 0:
            return cap
    except Exception:
        pass
    return 64 << 20  # conservative fallback = smallest current generation (v7x)


def _epilogue(h, b_ref, gamma_ref, beta_ref, o_ref, *, act, norm, eps, d_valid,
              gelu_approx):
    """bias -> (LayerNorm) -> activation -> store, all in f32 vregs."""
    h = h + b_ref[...].astype(jnp.float32)            # (TB, TN)

    if norm == "ln":
        inv_d = jnp.float32(1.0 / d_valid)
        # Padded feature columns of h are exactly zero (zero-padded weights /
        # bias / skip input), so plain row sums give exact statistics over the
        # d_valid real features -- no per-element mask needed.
        mean = jnp.sum(h, axis=-1, keepdims=True) * inv_d
        ex2 = jnp.sum(h * h, axis=-1, keepdims=True) * inv_d
        var = jnp.maximum(ex2 - mean * mean, 0.0)
        # Fuse gamma into the rsqrt scale: single scale+shift pass on the VPU.
        scale = jax.lax.rsqrt(var + eps) * gamma_ref[...].astype(jnp.float32)
        h = (h - mean) * scale + beta_ref[...].astype(jnp.float32)

    if act == "relu":
        h = jnp.maximum(h, 0.0)
    elif act == "leaky_relu":
        h = jnp.where(h >= 0.0, h, 0.01 * h)          # PyTorch default slope
    elif act == "gelu":
        if gelu_approx:
            # tanh-form GELU runs on the (otherwise idle) EUP slot; the erf
            # polynomial would land on the saturated VALU slots.  Differs from
            # PyTorch's exact erf GELU by <= ~3e-3.
            h = jax.nn.gelu(h, approximate=True)
        else:
            h = 0.5 * h * (1.0 + jax.lax.erf(h * jnp.float32(1.0 / math.sqrt(2.0))))
    elif act == "swish":
        h = h * jax.nn.sigmoid(h)
    # act is None -> identity

    o_ref[...] = h.astype(o_ref.dtype)


def _mlp_block_kernel(*refs, act, norm, skip_connect, eps, d_valid, num_k,
                      gelu_approx):
    refs = list(refs)
    x_ref = refs.pop(0)
    w_ref = refs.pop(0)
    b_ref = refs.pop(0)
    gamma_ref = beta_ref = None
    if norm == "ln":
        gamma_ref = refs.pop(0)
        beta_ref = refs.pop(0)
    xfull_ref = None
    if skip_connect and num_k > 1:
        xfull_ref = refs.pop(0)        # full-width x row block for the residual
    o_ref = refs.pop(0)
    acc_ref = refs.pop(0) if num_k > 1 else None

    # Native dtype straight to the MXU; f32 accumulation via preferred_element_type.
    x = x_ref[...]
    w = w_ref[...]

    if num_k == 1:
        acc = jnp.dot(x, w, preferred_element_type=jnp.float32)
        if skip_connect:
            # skip requires D_in == D_out (and N-tiling is disabled with skip).
            acc = acc + x.astype(jnp.float32)
        _epilogue(acc, b_ref, gamma_ref, beta_ref, o_ref,
                  act=act, norm=norm, eps=eps, d_valid=d_valid,
                  gelu_approx=gelu_approx)
    else:
        k = pl.program_id(2)

        @pl.when(k == 0)
        def _():
            acc_ref[...] = jnp.zeros_like(acc_ref)

        acc_ref[...] += jnp.dot(x, w, preferred_element_type=jnp.float32)

        @pl.when(k == num_k - 1)
        def _():
            acc = acc_ref[...]
            if skip_connect:
                acc = acc + xfull_ref[...].astype(jnp.float32)
            _epilogue(acc, b_ref, gamma_ref, beta_ref, o_ref,
                      act=act, norm=norm, eps=eps, d_valid=d_valid,
                      gelu_approx=gelu_approx)


def mlp_block(x, w, b, gamma=None, beta=None, *, act=None, norm=None,
              skip_connect=False, eps=1e-5, block_b=None, block_k=None,
              block_n=None, cast_to_bf16=False, gelu_approx=True):
    """Fused MlpBlock forward: out = act(norm(x @ w + b [+ x])).

    x: (B, D_in); w: (D_in, D_out) (transposed nn.Linear weight); b: (D_out,)
    gamma/beta: (D_out,) LayerNorm affine params, required iff norm == 'ln'.
    cast_to_bf16: opt-in bf16 MXU path for f32 inputs (keeps f32 accumulation).
    gelu_approx: use the tanh-form GELU (EUP) instead of PyTorch's exact erf form.
    """
    if norm == "bn":
        # TODO(synk): BatchNorm1d (batch statistics + running-stat updates) needs a
        # cross-tile batch reduction; not implemented in this fused kernel.
        raise NotImplementedError("norm='bn' is not supported by the Pallas kernel")
    if norm not in (None, "ln"):
        raise ValueError(f"unknown norm {norm!r}")
    if act not in (None, "relu", "leaky_relu", "gelu", "swish"):
        raise ValueError(f"unknown act {act!r}")

    B, D_in = x.shape
    D_in_w, D_out = w.shape
    assert D_in_w == D_in, "weight must be (D_in, D_out)"
    if skip_connect and D_in != D_out:
        raise ValueError("skip_connect requires input_size == output_size")
    if norm == "ln":
        assert gamma is not None and beta is not None

    out_dtype = x.dtype

    # ---- opt-in bf16 MXU path (f32 operands run as multi-pass MXU emulation) ----
    if cast_to_bf16 and x.dtype == jnp.float32:
        x = x.astype(jnp.bfloat16)
        w = w.astype(jnp.bfloat16)

    x_it = jnp.dtype(x.dtype).itemsize
    w_it = jnp.dtype(w.dtype).itemsize
    o_it = jnp.dtype(out_dtype).itemsize
    sub = _sublane(x.dtype)

    cap = _vmem_capacity_bytes()
    budget = int(cap * 0.85)

    # ---- feature padding: lane-dense (multiple-of-128) loads and stores --------
    D_in_pad = _round_up(D_in, _LANE)
    D_out_pad = _round_up(D_out, _LANE)

    # ---- K (D_in) tiling: stream the weight when it would not comfortably stay
    #      resident in VMEM.  Threshold is generation-aware (~19 MiB on v7x,
    #      ~38 MiB on v5e/v6e), keeping the no-accumulator resident path for as
    #      many weights as possible on the 128 MiB parts. -------------------------
    resident_thresh = int(cap * 0.30)
    w_bytes_full = D_in_pad * D_out_pad * w_it
    if block_k is None:
        k_tiled = (w_bytes_full > resident_thresh) and D_in_pad > 512
        block_k = 512 if k_tiled else D_in_pad
    else:
        block_k = _round_up(min(block_k, D_in_pad), _LANE)
        k_tiled = block_k < D_in_pad
    D_in_pad = _round_up(D_in_pad, block_k)
    if skip_connect:
        # keep padded output width == padded input width so the residual add
        # lands on matching columns
        D_out_pad = max(D_out_pad, D_in_pad)

    # ---- N (D_out) tiling: only when the epilogue is purely elementwise
    #      (LayerNorm needs the full feature row; skip needs matching columns) ---
    n_allowed = (norm is None) and (not skip_connect)
    if block_n is None or not n_allowed:
        block_n = D_out_pad
    else:
        block_n = _round_up(min(block_n, D_out_pad), _LANE)

    # ---- batch tiling: minimal padding, >= 2 tiles (v7x megacore), larger tiles
    #      on the K-tiled path to amortize per-batch-tile weight re-streaming ----
    auto_b = block_b is None
    target_b = (512 if k_tiled else 256) if auto_b else max(int(block_b), 1)
    num_b = max(1, _cdiv(B, target_b))
    block_b = _round_up(_cdiv(B, num_b), sub)
    if auto_b and num_b == 1 and B > sub:
        block_b = _round_up(_cdiv(B, 2), sub)

    # ---- VMEM footprint (incl. f32 epilogue temporaries) and auto-shrink -------
    def _footprint(bb, bk, bn):
        w_bufs = 1 if (not k_tiled and bn == D_out_pad) else 2
        f = bb * bk * x_it * 2                       # x tile (double-buffered)
        f += bk * bn * w_it * w_bufs                 # weight slab
        f += 6 * bn * 4                              # bias / gamma / beta rows
        f += bb * bn * o_it * 2                      # out tile (double-buffered)
        if k_tiled:
            f += bb * bn * 4                         # f32 accumulator scratch
            if skip_connect:
                f += bb * D_in_pad * x_it * 2        # full-width x for residual
        f += 3 * bb * bn * 4                         # f32 epilogue temporaries
        return f

    while _footprint(block_b, block_k, block_n) > budget:
        if n_allowed and block_n > 512:
            block_n = _round_up(block_n // 2, _LANE)
        elif k_tiled and block_k > 128 and (block_k // 2) % _LANE == 0:
            block_k //= 2
        elif block_b > sub:
            block_b = _round_up(max(block_b // 2, sub), sub)
        else:
            break

    if block_n < D_out_pad:
        D_out_pad = _round_up(D_out_pad, block_n)
    num_n = D_out_pad // block_n
    num_k = D_in_pad // block_k
    num_b = _cdiv(B, block_b)
    B_pad = num_b * block_b

    # ---- zero-pad operands (zeros keep matmul and LN statistics exact) ---------
    xp = x if (B_pad, D_in_pad) == x.shape else jnp.pad(
        x, ((0, B_pad - B), (0, D_in_pad - D_in)))
    wp = w if (D_in_pad, D_out_pad) == w.shape else jnp.pad(
        w, ((0, D_in_pad - D_in), (0, D_out_pad - D_out)))
    bp = jnp.pad(b, (0, D_out_pad - D_out)).reshape(1, D_out_pad)

    inputs = [xp, wp, bp]
    if norm == "ln":
        inputs.append(jnp.pad(gamma, (0, D_out_pad - D_out)).reshape(1, D_out_pad))
        inputs.append(jnp.pad(beta, (0, D_out_pad - D_out)).reshape(1, D_out_pad))
    if skip_connect and num_k > 1:
        inputs.append(xp)              # full-width x row block for the residual

    # ---- BlockSpecs (uniform 3-axis grid: batch, out-cols, reduction) ----------
    resident = pl.Buffered(1)          # invariant operands: no double-buffer copy
    w_resident = (num_k == 1 and num_n == 1)
    vec_resident = (num_n == 1)

    w_mode = None
    if w_resident:
        w_mode = resident
    elif num_k > 1 and block_b <= 256 and \
            _footprint(block_b, block_k, block_n) + block_k * block_n * w_it <= budget:
        # small batch tiles: a third weight buffer hides one more step of DMA
        # latency (matters most on v5e's ~0.8 TB/s HBM)
        w_mode = pl.Buffered(3)

    def _spec(shape, index_map, mode=None):
        if mode is None:
            return pl.BlockSpec(shape, index_map)
        return pl.BlockSpec(shape, index_map, pipeline_mode=mode)

    in_specs = [
        pl.BlockSpec((block_b, block_k), lambda i, n, k: (i, k)),
        _spec((block_k, block_n), lambda i, n, k: (k, n), w_mode),
        _spec((1, block_n), lambda i, n, k: (0, n),
              resident if vec_resident else None),
    ]
    if norm == "ln":
        in_specs += [_spec((1, block_n), lambda i, n, k: (0, n),
                           resident if vec_resident else None)] * 2
    if skip_connect and num_k > 1:
        in_specs.append(pl.BlockSpec((block_b, D_in_pad), lambda i, n, k: (i, 0)))

    out_specs = pl.BlockSpec((block_b, block_n), lambda i, n, k: (i, n))
    scratch_shapes = ([pltpu.VMEM((block_b, block_n), jnp.float32)]
                      if num_k > 1 else [])

    grid = (num_b, num_n, num_k)                        # reduction axis last
    dims = ("parallel", "parallel", "arbitrary")

    # ---- VMEM budget clamped to the physical per-TC capacity -------------------
    fp = _footprint(block_b, block_k, block_n)
    vmem_limit = int(min(max(int(fp * 1.25) + (2 << 20), 32 << 20), int(cap * 0.9)))

    x_bytes = B_pad * D_in_pad * x_it
    w_bytes = D_in_pad * D_out_pad * w_it
    o_bytes = B_pad * D_out_pad * o_it
    w_reads = 1 if w_resident else num_b     # streamed weight re-read per batch tile
    x_reads = num_n                          # x re-read per output-column tile
    cost = pl.CostEstimate(
        flops=2 * B_pad * D_in_pad * D_out_pad,
        transcendentals=(B_pad * D_out_pad if act in ("gelu", "swish") else 0),
        bytes_accessed=int(x_bytes * x_reads + w_bytes * w_reads + o_bytes),
    )

    kernel = functools.partial(
        _mlp_block_kernel, act=act, norm=norm, skip_connect=skip_connect,
        eps=eps, d_valid=D_out, num_k=num_k, gelu_approx=gelu_approx)

    out = pl.pallas_call(
        kernel,
        out_shape=jax.ShapeDtypeStruct((B_pad, D_out_pad), out_dtype),
        grid_spec=pltpu.PrefetchScalarGridSpec(
            num_scalar_prefetch=0,
            grid=grid,
            in_specs=in_specs,
            out_specs=out_specs,
            scratch_shapes=scratch_shapes,
        ),
        compiler_params=pltpu.CompilerParams(
            dimension_semantics=dims,
            vmem_limit_bytes=vmem_limit),
        cost_estimate=cost,
    )(*inputs)

    if (B_pad, D_out_pad) != (B, D_out):
        out = out[:B, :D_out]
    return out


def mlp_block_reference(x, w, b, gamma=None, beta=None, *, act=None, norm=None,
                        skip_connect=False, eps=1e-5):
    """Pure-JAX reference mirroring the PyTorch forward (erf GELU, f32 accumulate)."""
    h = jnp.dot(x, w, preferred_element_type=jnp.float32) + b.astype(jnp.float32)
    if skip_connect:
        h = h + x.astype(jnp.float32)
    if norm == "ln":
        mean = jnp.mean(h, axis=-1, keepdims=True)
        var = jnp.mean((h - mean) ** 2, axis=-1, keepdims=True)
        h = (h - mean) * jax.lax.rsqrt(var + eps) * gamma.astype(jnp.float32) \
            + beta.astype(jnp.float32)
    if act == "relu":
        h = jnp.maximum(h, 0.0)
    elif act == "leaky_relu":
        h = jnp.where(h >= 0.0, h, 0.01 * h)
    elif act == "gelu":
        h = 0.5 * h * (1.0 + jax.lax.erf(h / math.sqrt(2.0)))
    elif act == "swish":
        h = h * jax.nn.sigmoid(h)
    return h.astype(x.dtype)


if __name__ == "__main__":
    key = jax.random.PRNGKey(0)
    ks = jax.random.split(key, 12)

    # --- test 1: f32, lane-aligned, gelu + LayerNorm + skip, auto batch split ----
    B, D = 128, 128
    x = jax.random.normal(ks[0], (B, D), jnp.float32)
    bound = 1.0 / math.sqrt(D)
    w = jax.random.uniform(ks[1], (D, D), jnp.float32, -bound, bound)
    b = jax.random.uniform(ks[2], (D,), jnp.float32, -bound, bound)
    gamma = jnp.ones((D,), jnp.float32)   # nn.LayerNorm default weight
    beta = jnp.zeros((D,), jnp.float32)   # nn.LayerNorm default bias
    cfg = dict(act="gelu", norm="ln", skip_connect=True)
    out = jax.block_until_ready(mlp_block(x, w, b, gamma, beta, **cfg))
    ref = mlp_block_reference(x, w, b, gamma, beta, **cfg)
    assert out.shape == (B, D)
    # tanh-approximate GELU differs from the exact erf form by <= ~3e-3
    assert jnp.allclose(out, ref, atol=1e-2, rtol=1e-2), "test1 mismatch vs reference"

    # --- test 2: bf16, unaligned shapes (zero-padding + exact padded-LN stats) ---
    B2, Di, Do = 100, 96, 160
    x2 = jax.random.normal(ks[3], (B2, Di), jnp.bfloat16)
    bound2 = 1.0 / math.sqrt(Di)
    w2 = jax.random.uniform(ks[4], (Di, Do), jnp.float32, -bound2, bound2).astype(jnp.bfloat16)
    b2 = jax.random.uniform(ks[5], (Do,), jnp.float32, -bound2, bound2).astype(jnp.bfloat16)
    g2 = jnp.ones((Do,), jnp.bfloat16)
    be2 = jnp.zeros((Do,), jnp.bfloat16)
    cfg2 = dict(act="relu", norm="ln", skip_connect=False)
    out2 = jax.block_until_ready(mlp_block(x2, w2, b2, g2, be2, **cfg2))
    ref2 = mlp_block_reference(x2, w2, b2, g2, be2, **cfg2)
    assert out2.shape == (B2, Do)
    assert jnp.allclose(out2.astype(jnp.float32), ref2.astype(jnp.float32),
                        atol=3e-2, rtol=3e-2), "test2 mismatch vs reference"

    # --- test 3: forced K-tiling (accumulator + full-row residual), swish + LN ---
    B3, D3 = 64, 256
    x3 = jax.random.normal(ks[6], (B3, D3), jnp.float32)
    bound3 = 1.0 / math.sqrt(D3)
    w3 = jax.random.uniform(ks[7], (D3, D3), jnp.float32, -bound3, bound3)
    b3 = jax.random.uniform(ks[8], (D3,), jnp.float32, -bound3, bound3)
    g3 = jnp.ones((D3,), jnp.float32)
    be3 = jnp.zeros((D3,), jnp.float32)
    cfg3 = dict(act="swish", norm="ln", skip_connect=True)
    out3 = jax.block_until_ready(mlp_block(x3, w3, b3, g3, be3, **cfg3, block_k=128))
    ref3 = mlp_block_reference(x3, w3, b3, g3, be3, **cfg3)
    assert jnp.allclose(out3, ref3, atol=2e-3, rtol=2e-3), "test3 mismatch vs reference"

    # --- test 4: forced N (D_out) tiling, norm=None, leaky_relu -------------------
    B4, Di4, Do4 = 64, 64, 256
    x4 = jax.random.normal(ks[9], (B4, Di4), jnp.float32)
    bound4 = 1.0 / math.sqrt(Di4)
    w4 = jax.random.uniform(ks[10], (Di4, Do4), jnp.float32, -bound4, bound4)
    b4 = jax.random.uniform(ks[11], (Do4,), jnp.float32, -bound4, bound4)
    cfg4 = dict(act="leaky_relu", norm=None, skip_connect=False)
    out4 = jax.block_until_ready(mlp_block(x4, w4, b4, **cfg4, block_n=128))
    ref4 = mlp_block_reference(x4, w4, b4, **cfg4)
    assert jnp.allclose(out4, ref4, atol=1e-3, rtol=1e-3), "test4 mismatch vs reference"

    # --- test 5: opt-in bf16 MXU path for f32 inputs ------------------------------
    out5 = jax.block_until_ready(
        mlp_block(x, w, b, act="relu", norm=None, cast_to_bf16=True))
    ref5 = mlp_block_reference(x.astype(jnp.bfloat16).astype(jnp.float32),
                               w.astype(jnp.bfloat16).astype(jnp.float32),
                               b, act="relu", norm=None)
    assert jnp.allclose(out5, ref5, atol=1e-3, rtol=1e-3), "test5 mismatch vs reference"

    print("KERNEL_OK")
</pallas_src>

<mosaic_0001>
module attributes {stable_mosaic.version = 11 : i64} {
  func.func @_mlp_block_kernel(%arg0: i32, %arg1: i32, %arg2: i32, %arg3: memref<64x128xf32, #tpu.memory_space<vmem>>, %arg4: memref<128x128xf32, #tpu.memory_space<vmem>>, %arg5: memref<1x128xf32, #tpu.memory_space<vmem>>, %arg6: memref<1x128xf32, #tpu.memory_space<vmem>>, %arg7: memref<1x128xf32, #tpu.memory_space<vmem>>, %arg8: memref<64x128xf32, #tpu.memory_space<vmem>>) attributes {dimension_semantics = [#tpu.dimension_semantics<parallel>, #tpu.dimension_semantics<parallel>, #tpu.dimension_semantics<arbitrary>], iteration_bounds = array<i64: 2, 1, 1>, scalar_prefetch = 0 : i64, scratch_operands = 0 : i64, tpu.core_type = #tpu.core_type<tc>, window_params = [{transform_indices = @transform_0, window_bounds = array<i64: 64, 128>}, {pipeline_mode = #tpu.pipeline_mode<synchronous>, transform_indices = @transform_1, window_bounds = array<i64: 128, 128>}, {pipeline_mode = #tpu.pipeline_mode<synchronous>, transform_indices = @transform_2, window_bounds = array<i64: 1, 128>}, {pipeline_mode = #tpu.pipeline_mode<synchronous>, transform_indices = @transform_3, window_bounds = array<i64: 1, 128>}, {pipeline_mode = #tpu.pipeline_mode<synchronous>, transform_indices = @transform_4, window_bounds = array<i64: 1, 128>}, {transform_indices = @transform_5, window_bounds = array<i64: 64, 128>}]} {
    %c0 = arith.constant 0 : index
    %c0_0 = arith.constant 0 : index
    %0 = vector.load %arg3[%c0, %c0_0] : memref<64x128xf32, #tpu.memory_space<vmem>>, vector<64x128xf32>
    %c0_1 = arith.constant 0 : index
    %c0_2 = arith.constant 0 : index
    %1 = vector.load %arg4[%c0_1, %c0_2] : memref<128x128xf32, #tpu.memory_space<vmem>>, vector<128x128xf32>
    %cst = arith.constant dense<0.000000e+00> : vector<64x128xf32>
    %2 = tpu.matmul %0, %1, %cst {dimension_numbers = #tpu.dot_dimension_numbers<[1], [0], [0], [1], [0, 0, 1, 1], [], []>} : vector<64x128xf32>, vector<128x128xf32>, vector<64x128xf32> -> vector<64x128xf32>
    %3 = arith.addf %2, %0 : vector<64x128xf32>
    %c0_3 = arith.constant 0 : index
    %c0_4 = arith.constant 0 : index
    %4 = vector.load %arg5[%c0_3, %c0_4] : memref<1x128xf32, #tpu.memory_space<vmem>>, vector<1x128xf32>
    %5 = vector.broadcast %4 : vector<1x128xf32> to vector<64x128xf32>
    %6 = arith.addf %3, %5 : vector<64x128xf32>
    %cst_5 = arith.constant dense<0.000000e+00> : vector<64xf32>
    %7 = vector.multi_reduction <add>, %6, %cst_5 [1] : vector<64x128xf32> to vector<64xf32>
    %8 = vector.shape_cast %7 : vector<64xf32> to vector<64x1xf32>
    %cst_6 = arith.constant 7.812500e-03 : f32
    %9 = vector.broadcast %cst_6 : f32 to vector<64x1xf32>
    %10 = arith.mulf %8, %9 : vector<64x1xf32>
    %11 = arith.mulf %6, %6 : vector<64x128xf32>
    %cst_7 = arith.constant dense<0.000000e+00> : vector<64xf32>
    %12 = vector.multi_reduction <add>, %11, %cst_7 [1] : vector<64x128xf32> to vector<64xf32>
    %13 = vector.shape_cast %12 : vector<64xf32> to vector<64x1xf32>
    %cst_8 = arith.constant 7.812500e-03 : f32
    %14 = vector.broadcast %cst_8 : f32 to vector<64x1xf32>
    %15 = arith.mulf %13, %14 : vector<64x1xf32>
    %16 = arith.mulf %10, %10 : vector<64x1xf32>
    %17 = arith.subf %15, %16 : vector<64x1xf32>
    %cst_9 = arith.constant 0.000000e+00 : f32
    %18 = vector.broadcast %cst_9 : f32 to vector<64x1xf32>
    %19 = arith.maximumf %17, %18 : vector<64x1xf32>
    %cst_10 = arith.constant 9.99999974E-6 : f32
    %20 = vector.broadcast %cst_10 : f32 to vector<64x1xf32>
    %21 = arith.addf %19, %20 : vector<64x1xf32>
    %22 = math.rsqrt %21 : vector<64x1xf32>
    %c0_11 = arith.constant 0 : index
    %c0_12 = arith.constant 0 : index
    %23 = vector.load %arg6[%c0_11, %c0_12] : memref<1x128xf32, #tpu.memory_space<vmem>>, vector<1x128xf32>
    %24 = vector.broadcast %22 : vector<64x1xf32> to vector<64x128xf32>
    %25 = vector.broadcast %23 : vector<1x128xf32> to vector<64x128xf32>
    %26 = arith.mulf %24, %25 : vector<64x128xf32>
    %27 = vector.broadcast %10 : vector<64x1xf32> to vector<64x128xf32>
    %28 = arith.subf %6, %27 : vector<64x128xf32>
    %29 = arith.mulf %28, %26 : vector<64x128xf32>
    %c0_13 = arith.constant 0 : index
    %c0_14 = arith.constant 0 : index
    %30 = vector.load %arg7[%c0_13, %c0_14] : memref<1x128xf32, #tpu.memory_space<vmem>>, vector<1x128xf32>
    %31 = vector.broadcast %30 : vector<1x128xf32> to vector<64x128xf32>
    %32 = arith.addf %29, %31 : vector<64x128xf32>
    %33 = arith.mulf %32, %32 : vector<64x128xf32>
    %34 = arith.mulf %32, %33 : vector<64x128xf32>
    %cst_15 = arith.constant 4.471500e-02 : f32
    %35 = vector.broadcast %cst_15 : f32 to vector<64x128xf32>
    %36 = arith.mulf %35, %34 : vector<64x128xf32>
    %37 = arith.addf %32, %36 : vector<64x128xf32>
    %cst_16 = arith.constant 0.797884583 : f32
    %38 = vector.broadcast %cst_16 : f32 to vector<64x128xf32>
    %39 = arith.mulf %38, %37 : vector<64x128xf32>
    %40 = math.tanh %39 : vector<64x128xf32>
    %cst_17 = arith.constant 1.000000e+00 : f32
    %41 = vector.broadcast %cst_17 : f32 to vector<64x128xf32>
    %42 = arith.addf %41, %40 : vector<64x128xf32>
    %cst_18 = arith.constant 5.000000e-01 : f32
    %43 = vector.broadcast %cst_18 : f32 to vector<64x128xf32>
    %44 = arith.mulf %43, %42 : vector<64x128xf32>
    %45 = arith.mulf %32, %44 : vector<64x128xf32>
    %c0_19 = arith.constant 0 : index
    %c0_20 = arith.constant 0 : index
    %46 = vector.load %arg8[%c0_19, %c0_20] : memref<64x128xf32, #tpu.memory_space<vmem>>, vector<64x128xf32>
    tpu.vector_store %arg8[%c0_19, %c0_20], %45 {strides = array<i32>} : memref<64x128xf32, #tpu.memory_space<vmem>>, vector<64x128xf32>,
    return
  }
  func.func @transform_0(%arg0: i32, %arg1: i32, %arg2: i32) -> (i32, i32) {
    %c0_i32 = arith.constant 0 : i32
    return %arg0, %arg2 : i32, i32
  }
  func.func @transform_1(%arg0: i32, %arg1: i32, %arg2: i32) -> (i32, i32) {
    %c0_i32 = arith.constant 0 : i32
    return %arg2, %arg1 : i32, i32
  }
  func.func @transform_2(%arg0: i32, %arg1: i32, %arg2: i32) -> (i32, i32) {
    %c0_i32 = arith.constant 0 : i32
    %c0_i32_0 = arith.constant 0 : i32
    return %c0_i32, %arg1 : i32, i32
  }
  func.func @transform_3(%arg0: i32, %arg1: i32, %arg2: i32) -> (i32, i32) {
    %c0_i32 = arith.constant 0 : i32
    %c0_i32_0 = arith.constant 0 : i32
    return %c0_i32, %arg1 : i32, i32
  }
  func.func @transform_4(%arg0: i32, %arg1: i32, %arg2: i32) -> (i32, i32) {
    %c0_i32 = arith.constant 0 : i32
    %c0_i32_0 = arith.constant 0 : i32
    return %c0_i32, %arg1 : i32, i32
  }
  func.func @transform_5(%arg0: i32, %arg1: i32, %arg2: i32) -> (i32, i32) {
    %c0_i32 = arith.constant 0 : i32
    return %arg0, %arg1 : i32, i32
  }
}

</mosaic_0001>

<bundles_post_ra>
// kernel: tpu_custom_call.1
= control target key start
LH: loop header
LB: loop body
LE: loop exit
PB: predicated region body
PF: predicated region fallthrough
CT: control target
= control target key end

     0   :  { %10 = vsyncpa [#allocation3], 0  ;;  %s1698_s0 = inlined_call_operand.hbm [shape: f32[128,128], index: 0, kind: input, shape index: {}]   ;;  %s1699_s1 = inlined_call_operand.hbm [shape: f32[128,128], index: 1, kind: input, shape index: {}]   ;;  %s1700_s2 = inlined_call_operand.vmem [shape: f32[1,128], index: 2, kind: input, shape index: {}]   ;;  %s1701_s3 = inlined_call_operand.vmem [shape: f32[1,128], index: 3, kind: input, shape index: {}]   ;;  %s1702_s4 = inlined_call_operand.vmem [shape: f32[1,128], index: 4, kind: input, shape index: {}]   ;;  %s1703_s5 = inlined_call_operand.hbm [shape: f32[128,128], index: 5, kind: output, shape index: {}]  }
   0x1   :  { %12 = vsyncpa [#allocation3 + $0x1], 0 }
   0x2   :  { %13 = vsyncpa [#allocation6], 0 }
   0x3   :  { %14 = vsyncpa [#allocation4], 0 }
   0x4   :  { %16 = vsyncpa [#allocation4 + $0x1], 0  ;;  %s1290_s18 = smov 0   ;;  %s1292_s19 = smov 0  }
   0x5   :  { %s1294_s20 = smov 0   ;;  %s1296_s21 = smov 0  }
   0x6   :  { %s1298_s22 = smov 0   ;;  %s1300_s23 = smov 0  }
   0x7 LB: > { %s857_s24 = sadd.s32 4294967295, %s1251_s23   ;;  %s858_s25 = sadd.s32 4294967294, %s1251_s23   ;;  %s1251_s23 = sphi %s1300_s23, %s22_s23   ;;  %s1247_s22 = sphi %s1298_s22, %s1729_s22   ;;  %s1243_s21 = sphi %s1296_s21, %s1728_s21   ;;  %s1239_s20 = sphi %s1294_s20, %s1727_s20   ;;  %s1235_s19 = sphi %s1292_s19, %s1726_s19   ;;  %s1231_s18 = sphi %s1290_s18, %s1725_s18  }
   0x8   : > { %p63_p0 = scmp.ne.s32.totalorder %s1235_s19, %s1231_s18  ;;  %p1324_p1 = scmp.eq.s32.totalorder %s857_s24, 0 }
   0x9   : > { %p1328_p2 = scmp.eq.s32.totalorder %s857_s24, 1  ;;  %p201_p3 = scmp.eq.s32.totalorder %s858_s25, 1 }
   0xa   : > { %s1709_s26 = scalar_select %p1324_p1, 1, 0 }
   0xb   : > { %s1710_s27 = scalar_select %p1328_p2, 1, 0 }
   0xc   : > { %p1334_p4 = por %p1324_p1, %p63_p0  ;;  %p859_p5 = scmp.ge.s32.totalorder %s1251_s23, 1 }
   0xd   : > { %p1339_p6 = por %p201_p3, %p63_p0  ;;  %p208_p7 = scmp.lt.s32.totalorder %s1251_s23, 3 }
   0xe   : > { %s1711_s28 = scalar_select %p1334_p4, 1, 0 }
   0xf   : > { %s1712_s29 = scalar_select %p1339_p6, 1, 0 }
  0x10   : > { %p1344_p8 = pnand %p859_p5, %p208_p7  ;;  %s1253_s6 = smov [#allocation5]  }
  0x11   : > { %s224_s7 = sshll.u32 %s1253_s6, 4  ;;  %s41_s9 = sadd.s32 1, %s1247_s22  ;;  %s225_s7 = int_to_ptr.vmem [resolvable:$true] %s224_s7 }
  0x12   : > { %s1713_s30 = scalar_select %p1344_p8, 1, 0 }
  0x13   : > { %p1006_p9 = pneg %p1344_p8  ;;  %s1107_s12 = scalar_lea.hbm %s1699_s1, 2048 }
  0x14   : > { %p1108_p12 = scmp.ne.s32.totalorder %s1699_s1, %s1107_s12  ;;  %p1114_p5 = scmp.lt.u32.totalorder %s1107_s12, %s1699_s1 }
  0x15   : > { %p1353_p11 = pnand %p1006_p9, %p1324_p1 }
  0x17   : > { %p1109_p13 = pneg %p1353_p11 }
  0x19   : > { %p1110_p0 = pnand %p1109_p13, %p1108_p12 }
  0x1b   : > { %p1111_p3 = pneg %p1110_p0 }
  0x1d   : > { %p1116_p7 = pnand %p1114_p5, %p1111_p3 }
  0x1f   : > { %1119 = shalt.err (!%p1116_p7)
}
  0x20   : > { %s1120_s17 = scalar_lea.vmem %s225_s7, 2048  ;;  %p1128_p1 = scmp.lt.s32.totalorder %s225_s7, %s225_s7 }
  0x21   : > { %p1121_p9 = scmp.ne.s32.totalorder %s225_s7, %s1120_s17  ;;  %p1129_p4 = scmp.lt.s32.totalorder %s1120_s17, %s1120_s17 }
  0x23   : > { %p1123_p10 = pnand %p1121_p9, %p1109_p13  ;;  %p1130_p8 = por %p1129_p4, %p1128_p1 }
  0x25   : > { %p1124_p6 = pneg %p1123_p10 }
  0x27   : > { %p1131_p2 = pnand %p1130_p8, %p1124_p6 }
  0x29   : > { %1134 = shalt.err (!%p1131_p2)
}
  0x2a   : > { %s1708_s24 = smov 128   ;;  %s1255_s25 = smov 8  }
  0x2b   : > { %1009 = dma.hbm_to_vmem [thread:$0]  (!%p1353_p11), %s1699_s1, 2048, %s225_s7, [#allocation6], %s1708_s24, %s1708_s24, %s1255_s25  }
  0x2c   : > { %p43_p1 = scmp.ge.s32.totalorder %s41_s9, 2  ;;  %s50_s11 = sadd.s32 1, %s1239_s20 }
  0x2d   : > { %p57_p2 = scmp.ne.s32.totalorder %s1239_s20, %s1235_s19  ;;  %p58_p4 = scmp.eq.s32.totalorder %s1251_s23, 0 }
  0x2e   : > { %s1731_s9 = smov (%p43_p1, %s41_s9), 0  ;;  %p1716_p8 = scmp.ne.s32.totalorder %s1710_s27, 0 }
  0x2f   : > { %p1383_p6 = por %p58_p4, %p57_p2  ;;  %s45_s13 = ssub.s32 %s1247_s22, %s1731_s9 }
  0x30   : > { %p1389_p10 = por %p1716_p8, %p57_p2  ;;  %p1019_p12 = scmp.lt.s32.totalorder %s1251_s23, 2 }
  0x31   : > { %p48_p11 = scmp.eq.s32.totalorder %s45_s13, 0  ;;  %s256_s7 = sand.u32 1, %s1239_s20  }
  0x32   : > { %s865_s14 = sshll.u32 %s256_s7, 6  ;;  %s880_s16 = sshll.u32 %s1247_s22, 10 }
  0x33   : > { %s1398_s15 = scalar_select %p48_p11, %s1239_s20, %s50_s11  }
  0x34   : > { %s1404_s10 = scalar_lea.hbm %s1698_s0, %s880_s16  ;;  %s260_s27 = scalar_lea.vmem [#allocation2], %s865_s14 }
  0x35   : > { %s268_s24 = sshll.u32 %s260_s27, 4  ;;  %p1410_p13 = pnand %p1019_p12, %p1383_p6  ;;  %s1406_s24 = int_to_ptr.vmem [resolvable:$true] %s268_s24 }
  0x36   : > { %s1414_s11 = scalar_lea.sflag [#allocation3], %s256_s7  ;;  %s1135_s17 = scalar_lea.hbm %s1404_s10, 1024 }
  0x37   : > { %p1136_p0 = scmp.ne.s32.totalorder %s1404_s10, %s1135_s17  ;;  %p1137_p3 = pneg %p1410_p13 }
  0x38   : > { %s1140_s12 = scalar_lea.hbm %s1698_s0, 2048  ;;  %p1141_p9 = scmp.lt.u32.totalorder %s1404_s10, %s1698_s0 }
  0x39   : > { %p1138_p5 = pnand %p1137_p3, %p1136_p0  ;;  %p1142_p1 = scmp.lt.u32.totalorder %s1140_s12, %s1135_s17 }
  0x3a   : > { %p1144_p4 = scmp.lt.u32.totalorder %s1135_s17, %s1404_s10 }
  0x3b   : > { %p1139_p7 = pneg %p1138_p5  ;;  %p1143_p2 = por %p1142_p1, %p1141_p9 }
  0x3d   : > { %p1145_p6 = por %p1144_p4, %p1143_p2 }
  0x3f   : > { %p1146_p8 = pnand %p1145_p6, %p1139_p7 }
  0x41   : > { %1149 = shalt.err (!%p1146_p8)
}
  0x42   : > { %s1150_s7 = scalar_lea.vmem %s1406_s24, 1024  ;;  %s1256_s14 = smov [#allocation2]  }
  0x43   : > { %p1151_p12 = scmp.ne.s32.totalorder %s1406_s24, %s1150_s7  ;;  %s1155_s16 = sshll.u32 %s1256_s14, 4  ;;  %s1156_s16 = int_to_ptr.vmem [resolvable:$false] %s1155_s16 }
  0x44   : > { %s1157_s6 = scalar_lea.vmem %s1156_s16, 2048  ;;  %p1158_p5 = scmp.lt.s32.totalorder %s1406_s24, %s1156_s16 }
  0x45   : > { %p1153_p11 = pnand %p1151_p12, %p1137_p3  ;;  %p1159_p9 = scmp.lt.s32.totalorder %s1157_s6, %s1150_s7 }
  0x47   : > { %p1154_p0 = pneg %p1153_p11  ;;  %p1160_p1 = por %p1159_p9, %p1158_p5 }
  0x49   : > { %p1161_p2 = pnand %p1160_p1, %p1154_p0 }
  0x4b   : > { %1164 = shalt.err (!%p1161_p2)
}
  0x4c   : > { %s1719_s17 = smov 128   ;;  %p1720_p3 = scmp.ne.s32.totalorder %s1713_s30, 0 }
  0x4d   : > { %1013 = dma.hbm_to_vmem [thread:$0]  (!%p1410_p13), %s1404_s10, 1024, %s1406_s24, %s1414_s11, %s1719_s17, %s1719_s17, %s1255_s25  }
  0x4e   : > { %280 = sbr.rel (%p1720_p3) target bundleno = 579 (0x243), region = 40  ;;  %s1448_s12 = sand.u32 (!%p1720_p3), 1, %s1235_s19  }
  0x4f   : > { %s869_s27 = sshll.u32 (!%p1720_p3), %s1448_s12, 6  ;;  %s283_s7 = scalar_lea.sflag (!%p1720_p3), [#allocation3], %s1448_s12 }
  0x50   : > { %s1454_s13 = scalar_lea.vmem (!%p1720_p3), [#allocation2], %s869_s27  ;;  %p1721_p7 = scmp.ne.s32.totalorder (!%p1720_p3), %s1711_s28, 0 }
  0x55   : > { %1218 = dma.done.wait (%p1721_p7), %s283_s7, 1024  }
  0x56   : > { %1220 = vsyncadd (%p1721_p7), %s283_s7, 4294966272  ;;  %p1722_p13 = scmp.ne.s32.totalorder %s1709_s26, 0 }
  0x58   : > { %1222 = dma.done.wait (%p1722_p13), [#allocation6], 2048  }
  0x59   : > { %1224 = vsyncadd (%p1722_p13), [#allocation6], 4294965248  ;;  %v346_v0 = vld [vmem:[#allocation5] sm:$0xff]  ;;  %v347_v1 = vld [vmem:[#allocation5 + $0x8] sm:$0xff]  ;;  %s1626_s11 = scalar_lea.vmem [#allocation7], %s869_s27  ;;  %s881_s14 = sshll.u32 %s1243_s21, 10 }
  0x5a   : > { %v348_v2 = vld [vmem:[#allocation5 + $0x10] sm:$0xff]  ;;  %v950_v3 = vpack.c.bf16 %v347_v1, %v346_v0  ;;  %v349_v4 = vld [vmem:[#allocation5 + $0x18] sm:$0xff]  ;;  %v350_v6 = vld [vmem:[#allocation5 + $0x20] sm:$0xff]  ;;  %s719_s16 = sshll.u32 %s1626_s11, 4  ;;  %s1645_s27 = scalar_lea.hbm %s1703_s5, %s881_s14  ;;  %s1647_s16 = int_to_ptr.vmem [resolvable:$true] %s719_s16 }
  0x5b   : > { %v954_v5 = vpack.c.bf16 %v349_v4, %v348_v2  ;;  %v351_v7 = vld [vmem:[#allocation5 + $0x28] sm:$0xff]  ;;  %v1465_v9 = vld [vmem:[%s1454_s13 + $0x10] sm:$0xff]  ;;  %v353_v11 = vld [vmem:[#allocation5 + $0x38] sm:$0xff]  ;;  %s705_s7 = scalar_lea.sflag [#allocation4], %s1448_s12  ;;  %s1257_s21 = smov [#allocation7]  }
  0x5c   : > { %951 = vmatprep.subr.bf16.mxu0 %v950_v3  ;;  %982 = vmatprep.subr.bf16.mxu1 %v950_v3  ;;  %v958_v8 = vpack.c.bf16 %v351_v7, %v350_v6  ;;  %v352_v10 = vld [vmem:[#allocation5 + $0x30] sm:$0xff]  ;;  %v354_v13 = vld [vmem:[#allocation5 + $0x40] sm:$0xff]  ;;  %v355_v14 = vld [vmem:[#allocation5 + $0x48] sm:$0xff]  ;;  %s1169_s26 = sshll.u32 %s1257_s21, 4  ;;  %s1170_s26 = int_to_ptr.vmem [resolvable:$false] %s1169_s26 }
  0x5d   : > { %953 = vmatpush3.bf16.msra.mxu0 %v950_v3  ;;  %990 = vmatpush3.bf16.msra.mxu1 %v950_v3  ;;  %v962_v12 = vpack.c.bf16 %v353_v11, %v352_v10  ;;  %v966_v15 = vpack.c.bf16 %v355_v14, %v354_v13  ;;  %v356_v16 = vld [vmem:[#allocation5 + $0x50] sm:$0xff]  ;;  %v357_v17 = vld [vmem:[#allocation5 + $0x58] sm:$0xff]  ;;  %v358_v19 = vld [vmem:[#allocation5 + $0x60] sm:$0xff]  ;;  %s1171_s28 = scalar_lea.vmem %s1170_s26, 2048  ;;  %p1172_p12 = scmp.lt.s32.totalorder %s1647_s16, %s1170_s26 }
  0x5e   : > { %955 = vmatprep.subr.bf16.mxu0 %v954_v5  ;;  %983 = vmatprep.subr.bf16.mxu1 %v954_v5  ;;  %v970_v18 = vpack.c.bf16 %v357_v17, %v356_v16  ;;  %v359_v20 = vld [vmem:[#allocation5 + $0x68] sm:$0xff]  ;;  %v360_v22 = vld [vmem:[#allocation5 + $0x70] sm:$0xff]  ;;  %v361_v23 = vld [vmem:[#allocation5 + $0x78] sm:$0xff] }
  0x5f   : > { %941 = vmatprep.mubr.f32.mxu1 %v1465_v9  ;;  %v974_v21 = vpack.c.bf16 %v359_v20, %v358_v19  ;;  %v978_v24 = vpack.c.bf16 %v361_v23, %v360_v22  ;;  %v339_v25 = vld [vmem:[%s1454_s13 + $0x8] sm:$0xff]  ;;  %v338_v27 = vld [vmem:[%s1454_s13] sm:$0xff]  ;;  %v341_v29 = vld [vmem:[%s1454_s13 + $0x18] sm:$0xff] }
  0x60   : > { %v343_v26 = vld [vmem:[%s1454_s13 + $0x28] sm:$0xff]  ;;  %v342_v28 = vld [vmem:[%s1454_s13 + $0x20] sm:$0xff]  ;;  %v345_v30 = vld [vmem:[%s1454_s13 + $0x38] sm:$0xff] }
  0x61   : > { %957 = vmatpush3.bf16.msra.mxu0 %v954_v5  ;;  %991 = vmatpush3.bf16.msra.mxu1 %v954_v5  ;;  %v344_v31 = vld [vmem:[%s1454_s13 + $0x30] sm:$0xff]  ;;  %v872_v33 = vld [vmem:[%s1700_s2] ss:$0 sm:$0xff]  ;;  %s1165_s13 = scalar_lea.vmem %s1647_s16, 1024 }
  0x62   : > { %959 = vmatprep.subr.bf16.mxu0 %v958_v8  ;;  %984 = vmatprep.subr.bf16.mxu1 %v958_v8  ;;  %p1166_p4 = scmp.ne.s32.totalorder %s1647_s16, %s1165_s13  ;;  %p1173_p11 = scmp.lt.s32.totalorder %s1171_s28, %s1165_s13 }
  0x64   : > { %p1167_p6 = pnand %p1166_p4, %p1389_p10  ;;  %p1174_p0 = por %p1173_p11, %p1172_p12 }
  0x65   : > { %961 = vmatpush3.bf16.msra.mxu0 %v958_v8  ;;  %992 = vmatpush3.bf16.msra.mxu1 %v958_v8 }
  0x66   : > { %963 = vmatprep.subr.bf16.mxu0 %v962_v12  ;;  %985 = vmatprep.subr.bf16.mxu1 %v962_v12  ;;  %p1168_p8 = pneg %p1167_p6 }
  0x68   : > { %p1175_p5 = pnand %p1174_p0, %p1168_p8 }
  0x69   : > { %965 = vmatpush3.bf16.msra.mxu0 %v962_v12  ;;  %993 = vmatpush3.bf16.msra.mxu1 %v962_v12 }
  0x6a   : > { %967 = vmatprep.subr.bf16.mxu0 %v966_v15  ;;  %986 = vmatprep.subr.bf16.mxu1 %v966_v15 }
  0x6d   : > { %969 = vmatpush3.bf16.msra.mxu0 %v966_v15  ;;  %994 = vmatpush3.bf16.msra.mxu1 %v966_v15 }
  0x6e   : > { %971 = vmatprep.subr.bf16.mxu0 %v970_v18  ;;  %987 = vmatprep.subr.bf16.mxu1 %v970_v18 }
  0x71   : > { %973 = vmatpush3.bf16.msra.mxu0 %v970_v18  ;;  %995 = vmatpush3.bf16.msra.mxu1 %v970_v18 }
  0x72   : > { %975 = vmatprep.subr.bf16.mxu0 %v974_v21  ;;  %988 = vmatprep.subr.bf16.mxu1 %v974_v21 }
  0x75   : > { %977 = vmatpush3.bf16.msra.mxu0 %v974_v21  ;;  %996 = vmatpush3.bf16.msra.mxu1 %v974_v21 }
  0x76   : > { %979 = vmatprep.subr.bf16.mxu0 %v978_v24  ;;  %989 = vmatprep.subr.bf16.mxu1 %v978_v24 }
  0x79   : > { %981 = vmatpush3.bf16.msra.mxu0 %v978_v24  ;;  %997 = vmatpush3.bf16.msra.mxu1 %v978_v24 }
  0x7c   : > { %939 = vmatmul.mubr.f32.vlgmr.msra.gmra.mrb[0].mxu0 %v339_v25  ;;  %945 = vmatmul.mubr.f32.vlgmr.msra.gmra.mrb[0].mxu1 %v343_v26 }
  0x7d   : > { %938 = vmatprep.mubr.f32.mxu0 %v338_v27  ;;  %944 = vmatprep.mubr.f32.mxu1 %v342_v28 }
  0x80   : > { %942 = vmatmul.mubr.f32.gmra.mrb[2].mxu0 %v341_v29  ;;  %948 = vmatmul.mubr.f32.gmra.mrb[2].mxu1 %v345_v30 }
  0x81   : > { %947 = vmatprep.mubr.f32.mxu0 %v344_v31 }
 0x14f   : > { %v940_v32 = vpop.f32.mrb[0].mxu0  ;;  %v946_v34 = vpop.f32.mrb[0].mxu1 }
 0x150   : > { %v434_v35 = vadd.f32 %v940_v32, %v339_v25  ;;  %v454_v36 = vadd.f32 %v946_v34, %v343_v26  ;;  %v428_v37 = vpop.f32.mrb[1].mxu0  ;;  %v448_v38 = vpop.f32.mrb[1].mxu1 }
 0x151   : > { %v429_v41 = vadd.f32 %v428_v37, %v338_v27  ;;  %v449_v47 = vadd.f32 %v448_v38, %v342_v28 }
 0x152   : > { %v1478_v39 = vadd.f32 %v872_v33, %v434_v35  ;;  %v1480_v40 = vadd.f32 %v872_v33, %v454_v36  ;;  %v1536_v36 = vld [vmem:[%s1701_s3] ss:$0 sm:$0xff] }
 0x153   : > { %v943_v42 = vpop.f32.mrb[2].mxu0  ;;  %v949_v43 = vpop.f32.mrb[2].mxu1  ;;  %v1484_v46 = vadd.f32 %v872_v33, %v429_v41  ;;  %v1489_v50 = vadd.f32 %v872_v33, %v449_v47 }
 0x154   : > { %492 = vadd.xlane.f32.xlu1 %v1480_v40  ;;  %484 = vadd.xlane.f32.xlu0 %v1478_v39  ;;  %v438_v44 = vpop.f32.mrb[3].mxu0  ;;  %v458_v45 = vpop.f32.mrb[3].mxu1  ;;  %v507_v48 = vmul.f32 %v1478_v39, %v1478_v39  ;;  %v444_v49 = vadd.f32 %v943_v42, %v341_v29  ;;  %v511_v51 = vmul.f32 %v1480_v40, %v1480_v40 }
 0x155   : > { %v464_v53 = vadd.f32 %v949_v43, %v345_v30  ;;  %v506_v54 = vmul.f32 %v1484_v46, %v1484_v46  ;;  %v439_v56 = vadd.f32 %v438_v44, %v1465_v9  ;;  %v459_v57 = vadd.f32 %v458_v45, %v344_v31 }
 0x156   : > { %v1493_v52 = vadd.f32 %v872_v33, %v444_v49  ;;  %v510_v58 = vmul.f32 %v1489_v50, %v1489_v50 }
 0x157   : > { %v1498_v55 = vadd.f32 %v872_v33, %v464_v53  ;;  %v1505_v59 = vadd.f32 %v872_v33, %v439_v56  ;;  %v1507_v60 = vadd.f32 %v872_v33, %v459_v57  ;;  %v1551_v53 = vld [vmem:[%s1702_s4] ss:$0 sm:$0xff] }
 0x158   : > { %516 = vadd.xlane.f32.xlu1 %v507_v48  ;;  %482 = vadd.xlane.f32.xlu0 %v1484_v46  ;;  %v509_v61 = vmul.f32 %v1493_v52, %v1493_v52 }
 0x159   : > { %v508_v62 = vmul.f32 %v1505_v59, %v1505_v59  ;;  %v513_v63 = vmul.f32 %v1498_v55, %v1498_v55  ;;  %v512_v0 = vmul.f32 %v1507_v60, %v1507_v60 }
 0x15c   : > { %524 = vadd.xlane.f32.xlu1 %v511_v51  ;;  %490 = vadd.xlane.f32.xlu0 %v1489_v50 }
 0x160   : > { %488 = vadd.xlane.f32.xlu1 %v1493_v52  ;;  %514 = vadd.xlane.f32.xlu0 %v506_v54 }
 0x164   : > { %496 = vadd.xlane.f32.xlu1 %v1498_v55  ;;  %522 = vadd.xlane.f32.xlu0 %v510_v58 }
 0x168   : > { %486 = vadd.xlane.f32.xlu1 %v1505_v59  ;;  %494 = vadd.xlane.f32.xlu0 %v1507_v60 }
 0x16c   : > { %520 = vadd.xlane.f32.xlu1 %v509_v61  ;;  %518 = vadd.xlane.f32.xlu0 %v508_v62 }
 0x170   : > { %528 = vadd.xlane.f32.xlu1 %v513_v63  ;;  %526 = vadd.xlane.f32.xlu0 %v512_v0 }
 0x1e1   : > { %v493_v1 = vpop.xlane.xlu1 %492  ;;  %v485_v2 = vpop.xlane.xlu0 %484 }
 0x1e2   : > { %v499_v3 = vmul.f32 0.0078125, %v485_v2  ;;  %v1519_v6 = vmul.f32 0.0078125, %v493_v1 }
 0x1e4   : > { %v539_v7 = vmul.f32 %v499_v3, %v499_v3  ;;  %v543_v13 = vmul.f32 %v1519_v6, %v1519_v6  ;;  %v594_v42 = vsub.f32 %v1478_v39, %v499_v3  ;;  %v598_v61 = vsub.f32 %v1480_v40, %v1519_v6 }
 0x1e5   : > { %v517_v4 = vpop.xlane.xlu1 %516  ;;  %v483_v5 = vpop.xlane.xlu0 %482 }
 0x1e6   : > { %v531_v8 = vmul.f32 0.0078125, %v517_v4  ;;  %v1521_v10 = vmul.f32 0.0078125, %v483_v5 }
 0x1e8   : > { %v547_v9 = vsub.f32 %v531_v8, %v539_v7  ;;  %v538_v18 = vmul.f32 %v1521_v10, %v1521_v10 }
 0x1e9   : > { %v525_v11 = vpop.xlane.xlu1 %524  ;;  %v491_v12 = vpop.xlane.xlu0 %490 }
 0x1ea   : > { %v555_v14 = vmax.f32 %v547_v9, 0.0  ;;  %v535_v15 = vmul.f32 0.0078125, %v525_v11  ;;  %v1527_v22 = vmul.f32 0.0078125, %v491_v12 }
 0x1ec   : > { %v563_v16 = vadd.f32 1e-05, %v555_v14  ;;  %v551_v17 = vsub.f32 %v535_v15, %v543_v13  ;;  %v542_v28 = vmul.f32 %v1527_v22, %v1527_v22 }
 0x1ed   : > { %v489_v19 = vpop.xlane.xlu1 %488  ;;  %v515_v20 = vpop.xlane.xlu0 %514 }
 0x1ee   : > { %1075 = vrsqrt.f32 %v563_v16  ;;  %v559_v21 = vmax.f32 %v551_v17, 0.0  ;;  %v530_v23 = vmul.f32 0.0078125, %v515_v20  ;;  %v1531_v33 = vmul.f32 0.0078125, %v489_v19 }
 0x1f0   : > { %v567_v24 = vadd.f32 1e-05, %v559_v21  ;;  %v546_v25 = vsub.f32 %v530_v23, %v538_v18  ;;  %v541_v45 = vmul.f32 %v1531_v33, %v1531_v33  ;;  %v593_v18 = vsub.f32 %v1484_v46, %v1521_v10 }
 0x1f1   : > { %v497_v26 = vpop.xlane.xlu1 %496  ;;  %v523_v27 = vpop.xlane.xlu0 %522 }
 0x1f2   : > { %1077 = vrsqrt.f32 %v567_v24  ;;  %v554_v29 = vmax.f32 %v546_v25, 0.0  ;;  %v534_v30 = vmul.f32 0.0078125, %v523_v27  ;;  %v1544_v47 = vmul.f32 0.0078125, %v497_v26 }
 0x1f4   : > { %v562_v31 = vadd.f32 1e-05, %v554_v29  ;;  %v550_v32 = vsub.f32 %v534_v30, %v542_v28  ;;  %v545_v2 = vmul.f32 %v1544_v47, %v1544_v47  ;;  %v597_v28 = vsub.f32 %v1489_v50, %v1527_v22 }
 0x1f5   : > { %v487_v34 = vpop.xlane.xlu1 %486  ;;  %v495_v35 = vpop.xlane.xlu0 %494 }
 0x1f6   : > { %1079 = vrsqrt.f32 %v562_v31  ;;  %v558_v37 = vmax.f32 %v550_v32, 0.0  ;;  %v1538_v38 = vmul.f32 0.0078125, %v487_v34  ;;  %v1546_v48 = vmul.f32 0.0078125, %v495_v35 }
 0x1f8   : > { %v1076_v41 = vpop.eup %1075  ;;  %v566_v43 = vadd.f32 1e-05, %v558_v37  ;;  %v540_v39 = vmul.f32 %v1538_v38, %v1538_v38  ;;  %v544_v3 = vmul.f32 %v1546_v48, %v1546_v48 }
 0x1f9   : > { %v586_v44 = vmul.f32 %v1076_v41, %v1536_v36  ;;  %v521_v49 = vpop.xlane.xlu1 %520  ;;  %v519_v51 = vpop.xlane.xlu0 %518 }
 0x1fa   : > { %1081 = vrsqrt.f32 %v566_v43  ;;  %v533_v54 = vmul.f32 0.0078125, %v521_v49  ;;  %v532_v56 = vmul.f32 0.0078125, %v519_v51  ;;  %v596_v51 = vsub.f32 %v1493_v52, %v1531_v33 }
 0x1fb   : > { %v602_v57 = vmul.f32 %v594_v42, %v586_v44  ;;  %v600_v52 = vsub.f32 %v1498_v55, %v1544_v47 }
 0x1fc   : > { %v1078_v58 = vpop.eup %1077  ;;  %v549_v62 = vsub.f32 %v533_v54, %v541_v45  ;;  %v548_v63 = vsub.f32 %v532_v56, %v540_v39 }
 0x1fd   : > { %v1558_v0 = vadd.f32 %v1551_v53, %v602_v57  ;;  %v590_v1 = vmul.f32 %v1078_v58, %v1536_v36  ;;  %v529_v4 = vpop.xlane.xlu1 %528  ;;  %v527_v5 = vpop.xlane.xlu0 %526  ;;  %v595_v58 = vsub.f32 %v1505_v59, %v1538_v38  ;;  %v599_v59 = vsub.f32 %v1507_v60, %v1546_v48 }
 0x1fe   : > { %v557_v7 = vmax.f32 %v549_v62, 0.0  ;;  %v556_v8 = vmax.f32 %v548_v63, 0.0  ;;  %v537_v9 = vmul.f32 0.0078125, %v529_v4  ;;  %v536_v11 = vmul.f32 0.0078125, %v527_v5 }
 0x1ff   : > { %v625_v40 = vmul.f32 %v1558_v0, %v1558_v0  ;;  %v606_v6 = vmul.f32 %v598_v61, %v590_v1 }
 0x200   : > { %v1080_v12 = vpop.eup %1079  ;;  %v565_v13 = vadd.f32 1e-05, %v557_v7  ;;  %v564_v14 = vadd.f32 1e-05, %v556_v8  ;;  %v553_v15 = vsub.f32 %v537_v9, %v545_v2  ;;  %v552_v16 = vsub.f32 %v536_v11, %v544_v3 }
 0x201   : > { %v633_v17 = vmul.f32 %v625_v40, %v1558_v0  ;;  %v1571_v19 = vadd.f32 %v1551_v53, %v606_v6  ;;  %v585_v20 = vmul.f32 %v1080_v12, %v1536_v36 }
 0x202   : > { %1083 = vrsqrt.f32 %v565_v13  ;;  %v561_v21 = vmax.f32 %v553_v15, 0.0  ;;  %v560_v23 = vmax.f32 %v552_v16, 0.0 }
 0x203   : > { %v641_v24 = vmul.f32 0.044715, %v633_v17  ;;  %v629_v25 = vmul.f32 %v1571_v19, %v1571_v19  ;;  %v601_v26 = vmul.f32 %v593_v18, %v585_v20  ;;  %1085 = vrsqrt.f32 %v564_v14 }
 0x204   : > { %v1082_v27 = vpop.eup %1081  ;;  %v569_v29 = vadd.f32 1e-05, %v561_v21  ;;  %v568_v46 = vadd.f32 1e-05, %v560_v23 }
 0x205   : > { %v649_v10 = vadd.f32 %v641_v24, %v1558_v0  ;;  %v637_v30 = vmul.f32 %v629_v25, %v1571_v19  ;;  %v1581_v31 = vadd.f32 %v1551_v53, %v601_v26  ;;  %v589_v32 = vmul.f32 %v1082_v27, %v1536_v36 }
 0x206   : > { %1087 = vrsqrt.f32 %v569_v29 }
 0x207   : > { %v657_v34 = vmul.f32 0.7978846, %v649_v10  ;;  %v645_v35 = vmul.f32 0.044715, %v637_v30  ;;  %v624_v37 = vmul.f32 %v1581_v31, %v1581_v31  ;;  %v605_v41 = vmul.f32 %v597_v28, %v589_v32 }
 0x208   : > { %1089 = vrsqrt.f32 %v568_v46 }
 0x209   : > { %1091 = vtanh.f32 %v657_v34  ;;  %v653_v50 = vadd.f32 %v645_v35, %v1571_v19  ;;  %v632_v22 = vmul.f32 %v624_v37, %v1581_v31  ;;  %v1589_v42 = vadd.f32 %v1551_v53, %v605_v41 }
 0x20b   : > { %v661_v43 = vmul.f32 0.7978846, %v653_v50  ;;  %v640_v44 = vmul.f32 0.044715, %v632_v22  ;;  %v628_v45 = vmul.f32 %v1589_v42, %v1589_v42 }
 0x20c   : > { %v1084_v49 = vpop.eup %1083 }
 0x20d   : > { %v1086_v39 = vpop.eup %1085  ;;  %1093 = vtanh.f32 %v661_v43  ;;  %v648_v54 = vadd.f32 %v640_v44, %v1581_v31  ;;  %v636_v56 = vmul.f32 %v628_v45, %v1589_v42  ;;  %v588_v57 = vmul.f32 %v1084_v49, %v1536_v36 }
 0x20e   : > { %v587_v61 = vmul.f32 %v1086_v39, %v1536_v36 }
 0x20f   : > { %v656_v62 = vmul.f32 0.7978846, %v648_v54  ;;  %v644_v63 = vmul.f32 0.044715, %v636_v56  ;;  %v604_v1 = vmul.f32 %v596_v51, %v588_v57 }
 0x210   : > { %v1088_v2 = vpop.eup %1087  ;;  %v603_v33 = vmul.f32 %v595_v58, %v587_v61 }
 0x211   : > { %1095 = vtanh.f32 %v656_v62  ;;  %v652_v3 = vadd.f32 %v644_v63, %v1589_v42  ;;  %v1605_v4 = vadd.f32 %v1551_v53, %v604_v1  ;;  %v592_v5 = vmul.f32 %v1088_v2, %v1536_v36 }
 0x212   : > { %v1090_v7 = vpop.eup %1089  ;;  %v1611_v38 = vadd.f32 %v1551_v53, %v603_v33 }
 0x213   : > { %v1092_v8 = vpop.eup %1091  ;;  %v660_v9 = vmul.f32 0.7978846, %v652_v3  ;;  %v627_v55 = vmul.f32 %v1605_v4, %v1605_v4  ;;  %v608_v47 = vmul.f32 %v600_v52, %v592_v5  ;;  %v591_v11 = vmul.f32 %v1090_v7, %v1536_v36 }
 0x214   : > { %v673_v40 = vadd.f32 1.0, %v1092_v8  ;;  %v626_v6 = vmul.f32 %v1611_v38, %v1611_v38 }
 0x215   : > { %1097 = vtanh.f32 %v660_v9  ;;  %v635_v12 = vmul.f32 %v627_v55, %v1605_v4  ;;  %v623_v60 = vadd.f32 %v1551_v53, %v608_v47  ;;  %v607_v48 = vmul.f32 %v599_v59, %v591_v11 }
 0x216   : > { %v681_v13 = vmul.f32 0.5, %v673_v40  ;;  %v634_v14 = vmul.f32 %v626_v6, %v1611_v38 }
 0x217   : > { %v1094_v15 = vpop.eup %1093  ;;  %v643_v16 = vmul.f32 0.044715, %v635_v12  ;;  %v631_v17 = vmul.f32 %v623_v60, %v623_v60  ;;  %v622_v18 = vadd.f32 %v1551_v53, %v607_v48 }
 0x218   : > { %v689_v36 = vmul.f32 %v681_v13, %v1558_v0  ;;  %v677_v20 = vadd.f32 1.0, %v1094_v15  ;;  %v642_v21 = vmul.f32 0.044715, %v634_v14 }
 0x219   : > { %v651_v23 = vadd.f32 %v643_v16, %v1605_v4  ;;  %v639_v24 = vmul.f32 %v631_v17, %v623_v60  ;;  %v630_v25 = vmul.f32 %v622_v18, %v622_v18 }
 0x21a   : > { %697 = vst [vmem:[%s1626_s11 + $0x8] sm:$0xff] %v689_v36  ;;  %v685_v26 = vmul.f32 0.5, %v677_v20  ;;  %v650_v27 = vadd.f32 %v642_v21, %v1611_v38 }
 0x21b   : > { %v1096_v28 = vpop.eup %1095  ;;  %v659_v29 = vmul.f32 0.7978846, %v651_v23  ;;  %v647_v53 = vmul.f32 0.044715, %v639_v24  ;;  %v638_v46 = vmul.f32 %v630_v25, %v622_v18 }
 0x21c   : > { %v693_v0 = vmul.f32 %v685_v26, %v1571_v19  ;;  %v672_v10 = vadd.f32 1.0, %v1096_v28  ;;  %v658_v30 = vmul.f32 0.7978846, %v650_v27 }
 0x21d   : > { %1099 = vtanh.f32 %v659_v29  ;;  %v655_v32 = vadd.f32 %v647_v53, %v623_v60  ;;  %v646_v34 = vmul.f32 0.044715, %v638_v46 }
 0x21e   : > { %701 = vst [vmem:[%s1626_s11 + $0x28] sm:$0xff] %v693_v0  ;;  %v680_v35 = vmul.f32 0.5, %v672_v10  ;;  %1101 = vtanh.f32 %v658_v30 }
 0x21f   : > { %v1098_v37 = vpop.eup %1097  ;;  %v663_v41 = vmul.f32 0.7978846, %v655_v32  ;;  %v654_v50 = vadd.f32 %v646_v34, %v622_v18 }
 0x220   : > { %v688_v22 = vmul.f32 %v680_v35, %v1581_v31  ;;  %v676_v43 = vadd.f32 1.0, %v1098_v37 }
 0x221   : > { %1103 = vtanh.f32 %v663_v41  ;;  %v662_v44 = vmul.f32 0.7978846, %v654_v50 }
 0x222   : > { %696 = vst [vmem:[%s1626_s11] sm:$0xff] %v688_v22  ;;  %v684_v19 = vmul.f32 0.5, %v676_v43 }
 0x223   : > { %1105 = vtanh.f32 %v662_v44 }
 0x224   : > { %v692_v45 = vmul.f32 %v684_v19, %v1589_v42 }
 0x226   : > { %700 = vst [vmem:[%s1626_s11 + $0x20] sm:$0xff] %v692_v45 }
 0x227   : > { %v1100_v49 = vpop.eup %1099 }
 0x228   : > { %v1102_v51 = vpop.eup %1101  ;;  %v675_v39 = vadd.f32 1.0, %v1100_v49 }
 0x229   : > { %v674_v54 = vadd.f32 1.0, %v1102_v51 }
 0x22a   : > { %v683_v56 = vmul.f32 0.5, %v675_v39 }
 0x22b   : > { %v1104_v57 = vpop.eup %1103  ;;  %v682_v31 = vmul.f32 0.5, %v674_v54 }
 0x22c   : > { %v691_v58 = vmul.f32 %v683_v56, %v1605_v4  ;;  %v679_v61 = vadd.f32 1.0, %v1104_v57 }
 0x22d   : > { %v1106_v62 = vpop.eup %1105  ;;  %v690_v42 = vmul.f32 %v682_v31, %v1611_v38 }
 0x22e   : > { %699 = vst [vmem:[%s1626_s11 + $0x18] sm:$0xff] %v691_v58  ;;  %v687_v63 = vmul.f32 0.5, %v679_v61  ;;  %v678_v1 = vadd.f32 1.0, %v1106_v62 }
 0x22f   : > { %698 = vst [vmem:[%s1626_s11 + $0x10] sm:$0xff] %v690_v42 }
 0x230   : > { %v695_v2 = vmul.f32 %v687_v63, %v623_v60  ;;  %v686_v52 = vmul.f32 0.5, %v678_v1 }
 0x232   : > { %703 = vst [vmem:[%s1626_s11 + $0x38] sm:$0xff] %v695_v2  ;;  %v694_v33 = vmul.f32 %v686_v52, %v622_v18 }
 0x234   : > { %702 = vst [vmem:[%s1626_s11 + $0x30] sm:$0xff] %v694_v33 }
 0x235   : > { %1178 = shalt.err (!%p1175_p5)
}
 0x236   : > { %s1179_s30 = scalar_lea.hbm %s1645_s27, 1024  ;;  %s1183_s10 = scalar_lea.hbm %s1703_s5, 2048 }
 0x237   : > { %p1180_p9 = scmp.ne.s32.totalorder %s1645_s27, %s1179_s30  ;;  %p1184_p3 = scmp.lt.u32.totalorder %s1645_s27, %s1703_s5 }
 0x238   : > { %p1185_p7 = scmp.lt.u32.totalorder %s1183_s10, %s1179_s30  ;;  %p1187_p4 = scmp.lt.u32.totalorder %s1179_s30, %s1645_s27 }
 0x239   : > { %p1181_p1 = pnand %p1180_p9, %p1389_p10 }
 0x23a   : > { %p1186_p13 = por %p1185_p7, %p1184_p3 }
 0x23b   : > { %p1182_p2 = pneg %p1181_p1 }
 0x23c   : > { %p1188_p6 = por %p1187_p4, %p1186_p13 }
 0x23e   : > { %p1189_p8 = pnand %p1188_p6, %p1182_p2 }
 0x240   : > { %1192 = shalt.err (!%p1189_p8)
}
 0x241   : > { %s1258_s6 = smov 128   ;;  %s1259_s17 = smov 8  }
 0x242   : > { %1004 = dma.vmem_to_hbm [thread:$0]  (%p1389_p10), %s1647_s16, 1024, %s1645_s27, %s705_s7, %s1258_s6, %s1258_s6, %s1259_s17  }
 0x243 PF: > { %s734_s13 = sand.u32 1, %s1231_s18   ;;  %p1723_p12 = scmp.ne.s32.totalorder %s1712_s29, 0 }
 0x244   : > { %p1724_p11 = scmp.ge.s32.totalorder %s1251_s23, 2  ;;  %s735_s21 = scalar_lea.sflag [#allocation4], %s734_s13 }
 0x246   : > { %p1015_p0 = pnand %p1724_p11, %p1723_p12 }
 0x248   : > { %1226 = dma.done.wait (!%p1015_p0), %s735_s21, 1024  }
 0x249   : > { %1228 = vsyncadd (!%p1015_p0), %s735_s21, 4294966272  ;;  %s22_s23 = sadd.s32 1, %s1251_s23   ;;  %s1725_s18 = smov %s1235_s19 }
 0x24a   : > { %p19_p5 = scmp.ge.s32.totalorder %s22_s23, 4   ;;  %s1726_s19 = smov %s1239_s20 }
 0x24b   : > { %s1727_s20 = smov %s1398_s15  ;;  %s1728_s21 = smov %s1247_s22 }
 0x24c   : > { %s1729_s22 = smov %s1731_s9  ;;  %21 = sbr.rel (!%p19_p5) target bundleno = 7 (0x7), region = 99 }
 0x253   :  { %740 = vsyncpa [#allocation3], 1 }
 0x254   :  { %742 = vsyncpa [#allocation3 + $0x1], 1 }
 0x255   :  { %743 = vsyncpa [#allocation6], 1 }
 0x256   :  { %744 = vsyncpa [#allocation4], 1 }
 0x257   :  { %746 = vsyncpa [#allocation4 + $0x1], 1 }

</bundles_post_ra>
